<compile_context>
chip_gen: v5e
topology: v5e:2x2
jax: 0.10.0
libtpu: 0.0.40
codegen_flags: <defaults>
</compile_context>

<pallas_src>
import jax
import jax.numpy as jnp
from jax.experimental import pallas as pl
from jax.experimental.pallas import tpu as pltpu


# ----------------------------------------------------------------------------
# Fused kernel: graph model -> encoder/pool -> VQ -> classifier + recon heads
# ----------------------------------------------------------------------------
def fused_forward_kernel(adj_ref, lemb_ref, wg_ref, bg_ref,
                         x2d_ref, pool_ref, we_ref, be_ref,
                         cb_ref, emb_ref,
                         lab_ref, zt_ref, zq_ref, idx_ref, cls_ref, rec_ref):
    f32 = jnp.float32
    bf16 = jnp.bfloat16

    # ---- graph model: label_matrix = relu((A_norm @ E_label) @ Wg + bg) ----
    agg = jnp.dot(adj_ref[...], lemb_ref[...], preferred_element_type=f32)   # [L,D]
    lab = jnp.maximum(
        jnp.dot(agg.astype(bf16), wg_ref[...], preferred_element_type=f32)
        + bg_ref[...],
        0.0)                                                                 # [L,D] f32
    lab_ref[...] = lab

    # ---- encoder: h = tanh(X @ We + be);  z_t = pool_mat @ h (masked mean) --
    h = jnp.tanh(jnp.dot(x2d_ref[...], we_ref[...], preferred_element_type=f32)
                 + be_ref[...])                                              # [B*S,D] f32
    z_t = jnp.dot(pool_ref[...], h, preferred_element_type=f32)              # [B,D]  f32
    zt_ref[...] = z_t

    # ---- vector quantization: nearest codebook entry ------------------------
    cb = cb_ref[...]                                                         # [K,D] f32
    score = jax.lax.dot_general(z_t, cb, (((1,), (1,)), ((), ())),
                                preferred_element_type=f32)                  # [B,K]
    c2 = jnp.sum(cb * cb, axis=-1)[None, :]                                  # [1,K]
    dist = c2 - 2.0 * score        # argmin-equivalent distance (|z|^2 dropped)
    idx = jnp.argmin(dist, axis=-1)                                          # [B]
    onehot = (jax.lax.broadcasted_iota(jnp.int32, dist.shape, 1)
              == idx[:, None]).astype(f32)                                   # [B,K]
    z_q = jnp.dot(onehot, cb, preferred_element_type=f32)                    # [B,D]
    zq_ref[...] = z_q
    idx_ref[...] = idx[:, None].astype(jnp.int32)

    # ---- heads: classifier + reconstruction (contract dim 1, no .T) ---------
    cls_ref[...] = jax.lax.dot_general(
        z_t.astype(bf16), lab.astype(bf16), (((1,), (1,)), ((), ())),
        preferred_element_type=f32)                                          # [B,L]
    rec_ref[...] = jax.lax.dot_general(
        z_q.astype(bf16), emb_ref[...], (((1,), (1,)), ((), ())),
        preferred_element_type=f32)                                          # [B,V]


def run_fused(adj_bf, lemb_bf, wg_bf, bg, x2d_bf, pool_mat, we_bf, be,
              codebook, emb_bf, batch):
    L, D = lemb_bf.shape
    V = emb_bf.shape[0]
    vmem = pl.BlockSpec(memory_space=pltpu.MemorySpace.VMEM)
    return pl.pallas_call(
        fused_forward_kernel,
        out_shape=(
            jax.ShapeDtypeStruct((L, D), jnp.float32),      # label_matrix
            jax.ShapeDtypeStruct((batch, D), jnp.float32),  # z_t (pooled_memory)
            jax.ShapeDtypeStruct((batch, D), jnp.float32),  # z_q
            jax.ShapeDtypeStruct((batch, 1), jnp.int32),    # vq_idx
            jax.ShapeDtypeStruct((batch, L), jnp.float32),  # classifier logits
            jax.ShapeDtypeStruct((batch, V), jnp.float32),  # recon logits
        ),
        in_specs=[vmem] * 10,
        out_specs=(vmem, vmem, vmem, vmem, vmem, vmem),
        compiler_params=pltpu.CompilerParams(
            vmem_limit_bytes=32 * 1024 * 1024),
    )(adj_bf, lemb_bf, wg_bf, bg, x2d_bf, pool_mat, we_bf, be, codebook, emb_bf)


# ----------------------------------------------------------------------------
# Full forward pass (mirrors New_Model.forward data-flow)
# ----------------------------------------------------------------------------
@jax.jit
def new_model_forward(params, input_idx, x_pad_mask):
    B, S = input_idx.shape
    bf16 = jnp.bfloat16

    # bf16 operand copies for MXU matmuls (accumulation stays f32 in-kernel)
    emb_bf = params['emb_table'].astype(bf16)
    adj_bf = params['adj_norm'].astype(bf16)
    lemb_bf = params['label_emb'].astype(bf16)
    wg_bf = params['wg'].astype(bf16)
    we_bf = params['we'].astype(bf16)

    # embedding lookup flattened to one 2-D activation slab [B*S, D]
    x2d = jnp.take(emb_bf, input_idx.reshape(-1), axis=0)

    # masked mean pooling expressed as a block-diagonal [B, B*S] matmul operand
    mask = x_pad_mask.astype(jnp.float32)                                 # [B,S]
    denom = jnp.maximum(jnp.sum(mask, axis=1, keepdims=True), 1.0)
    pool = mask / denom                                                   # [B,S]
    eye = jnp.eye(B, dtype=jnp.float32)
    pool_mat = (eye[:, :, None] * pool[:, None, :]).reshape(B, B * S)     # [B,B*S]

    (label_matrix, z_t, z_q, vq_idx,
     cls_logits, recon_logits) = run_fused(adj_bf, lemb_bf, wg_bf, params['bg'],
                                           x2d, pool_mat, we_bf, params['be'],
                                           params['codebook'], emb_bf, B)

    return {
        'label_matrix': label_matrix,
        'enc_outdict_t': {'pooled_memory': z_t},
        'vq_idx': vq_idx,
        'z_q': z_q,
        'recon_logits': recon_logits,
        'classifier': cls_logits,
    }


def make_params(key, vocab=64, d=32, labels=16, disper_num=16):
    ks = jax.random.split(key, 8)
    emb_table = jax.random.normal(ks[0], (vocab, d), jnp.float32) * 0.1
    label_emb = jax.random.normal(ks[1], (labels, d), jnp.float32) * 0.1
    wg = jax.random.normal(ks[2], (d, d), jnp.float32) * 0.1
    bg = jnp.zeros((1, d), jnp.float32)
    we = jax.random.normal(ks[3], (d, d), jnp.float32) * 0.1
    be = jnp.zeros((1, d), jnp.float32)
    codebook = jax.random.normal(ks[4], (disper_num, d), jnp.float32) * 0.1

    # adjacency (parent graph) with self-loops, row-normalized (done in glue)
    adj = (jax.random.uniform(ks[5], (labels, labels)) > 0.7).astype(jnp.float32)
    adj = adj + jnp.eye(labels, dtype=jnp.float32)
    adj_norm = adj / jnp.sum(adj, axis=-1, keepdims=True)

    return {
        'emb_table': emb_table,
        'label_emb': label_emb,
        'wg': wg, 'bg': bg,
        'we': we, 'be': be,
        'codebook': codebook,
        'adj_norm': adj_norm,
    }


if __name__ == "__main__":
    key = jax.random.PRNGKey(0)
    k_params, k_idx, k_mask = jax.random.split(key, 3)

    B, S, VOCAB, D, L, K = 2, 8, 64, 32, 16, 16
    params = make_params(k_params, vocab=VOCAB, d=D, labels=L, disper_num=K)

    input_idx = jax.random.randint(k_idx, (B, S), 0, VOCAB, dtype=jnp.int32)
    # pad mask: last two positions of second example padded out
    x_pad_mask = jnp.ones((B, S), jnp.float32).at[1, -2:].set(0.0)

    out = new_model_forward(params, input_idx, x_pad_mask)
    jax.block_until_ready(out)

    assert out['label_matrix'].shape == (L, D)
    assert out['enc_outdict_t']['pooled_memory'].shape == (B, D)
    assert out['z_q'].shape == (B, D)
    assert out['vq_idx'].shape == (B, 1)
    assert out['classifier'].shape == (B, L)
    assert out['recon_logits'].shape == (B, VOCAB)
    print("KERNEL_OK")
</pallas_src>

<mosaic_0001>
module attributes {stable_mosaic.version = 11 : i64} {
  func.func @fused_forward_kernel(%arg0: memref<16x16xbf16, #tpu.memory_space<vmem>>, %arg1: memref<16x32xbf16, #tpu.memory_space<vmem>>, %arg2: memref<32x32xbf16, #tpu.memory_space<vmem>>, %arg3: memref<1x32xf32, #tpu.memory_space<vmem>>, %arg4: memref<16x32xbf16, #tpu.memory_space<vmem>>, %arg5: memref<2x16xf32, #tpu.memory_space<vmem>>, %arg6: memref<32x32xbf16, #tpu.memory_space<vmem>>, %arg7: memref<1x32xf32, #tpu.memory_space<vmem>>, %arg8: memref<16x32xf32, #tpu.memory_space<vmem>>, %arg9: memref<64x32xbf16, #tpu.memory_space<vmem>>, %arg10: memref<16x32xf32, #tpu.memory_space<vmem>>, %arg11: memref<2x32xf32, #tpu.memory_space<vmem>>, %arg12: memref<2x32xf32, #tpu.memory_space<vmem>>, %arg13: memref<2x1xi32, #tpu.memory_space<vmem>>, %arg14: memref<2x16xf32, #tpu.memory_space<vmem>>, %arg15: memref<2x64xf32, #tpu.memory_space<vmem>>) attributes {dimension_semantics = [], scalar_prefetch = 0 : i64, scratch_operands = 0 : i64, tpu.core_type = #tpu.core_type<tc>} {
    %c0 = arith.constant 0 : index
    %c0_0 = arith.constant 0 : index
    %0 = vector.load %arg0[%c0, %c0_0] : memref<16x16xbf16, #tpu.memory_space<vmem>>, vector<16x16xbf16>
    %c0_1 = arith.constant 0 : index
    %c0_2 = arith.constant 0 : index
    %1 = vector.load %arg1[%c0_1, %c0_2] : memref<16x32xbf16, #tpu.memory_space<vmem>>, vector<16x32xbf16>
    %cst = arith.constant dense<0.000000e+00> : vector<16x32xf32>
    %2 = tpu.matmul %0, %1, %cst {dimension_numbers = #tpu.dot_dimension_numbers<[1], [0], [0], [1], [0, 0, 1, 1], [], []>} : vector<16x16xbf16>, vector<16x32xbf16>, vector<16x32xf32> -> vector<16x32xf32>
    %3 = arith.truncf %2 : vector<16x32xf32> to vector<16x32xbf16>
    %c0_3 = arith.constant 0 : index
    %c0_4 = arith.constant 0 : index
    %4 = vector.load %arg2[%c0_3, %c0_4] : memref<32x32xbf16, #tpu.memory_space<vmem>>, vector<32x32xbf16>
    %cst_5 = arith.constant dense<0.000000e+00> : vector<16x32xf32>
    %5 = tpu.matmul %3, %4, %cst_5 {dimension_numbers = #tpu.dot_dimension_numbers<[1], [0], [0], [1], [0, 0, 1, 1], [], []>} : vector<16x32xbf16>, vector<32x32xbf16>, vector<16x32xf32> -> vector<16x32xf32>
    %c0_6 = arith.constant 0 : index
    %c0_7 = arith.constant 0 : index
    %6 = vector.load %arg3[%c0_6, %c0_7] : memref<1x32xf32, #tpu.memory_space<vmem>>, vector<1x32xf32>
    %7 = vector.broadcast %6 : vector<1x32xf32> to vector<16x32xf32>
    %8 = arith.addf %5, %7 : vector<16x32xf32>
    %cst_8 = arith.constant 0.000000e+00 : f32
    %9 = vector.broadcast %cst_8 : f32 to vector<16x32xf32>
    %10 = arith.maximumf %8, %9 : vector<16x32xf32>
    %c0_9 = arith.constant 0 : index
    %c0_10 = arith.constant 0 : index
    %11 = vector.load %arg10[%c0_9, %c0_10] : memref<16x32xf32, #tpu.memory_space<vmem>>, vector<16x32xf32>
    tpu.vector_store %arg10[%c0_9, %c0_10], %10 {strides = array<i32>} : memref<16x32xf32, #tpu.memory_space<vmem>>, vector<16x32xf32>,
    %c0_11 = arith.constant 0 : index
    %c0_12 = arith.constant 0 : index
    %12 = vector.load %arg4[%c0_11, %c0_12] : memref<16x32xbf16, #tpu.memory_space<vmem>>, vector<16x32xbf16>
    %c0_13 = arith.constant 0 : index
    %c0_14 = arith.constant 0 : index
    %13 = vector.load %arg6[%c0_13, %c0_14] : memref<32x32xbf16, #tpu.memory_space<vmem>>, vector<32x32xbf16>
    %cst_15 = arith.constant dense<0.000000e+00> : vector<16x32xf32>
    %14 = tpu.matmul %12, %13, %cst_15 {dimension_numbers = #tpu.dot_dimension_numbers<[1], [0], [0], [1], [0, 0, 1, 1], [], []>} : vector<16x32xbf16>, vector<32x32xbf16>, vector<16x32xf32> -> vector<16x32xf32>
    %c0_16 = arith.constant 0 : index
    %c0_17 = arith.constant 0 : index
    %15 = vector.load %arg7[%c0_16, %c0_17] : memref<1x32xf32, #tpu.memory_space<vmem>>, vector<1x32xf32>
    %16 = vector.broadcast %15 : vector<1x32xf32> to vector<16x32xf32>
    %17 = arith.addf %14, %16 : vector<16x32xf32>
    %18 = math.tanh %17 : vector<16x32xf32>
    %c0_18 = arith.constant 0 : index
    %c0_19 = arith.constant 0 : index
    %19 = vector.load %arg5[%c0_18, %c0_19] : memref<2x16xf32, #tpu.memory_space<vmem>>, vector<2x16xf32>
    %cst_20 = arith.constant dense<0.000000e+00> : vector<2x32xf32>
    %20 = tpu.matmul %19, %18, %cst_20 {dimension_numbers = #tpu.dot_dimension_numbers<[1], [0], [0], [1], [0, 0, 1, 1], [], []>} : vector<2x16xf32>, vector<16x32xf32>, vector<2x32xf32> -> vector<2x32xf32>
    %c0_21 = arith.constant 0 : index
    %c0_22 = arith.constant 0 : index
    %21 = vector.load %arg11[%c0_21, %c0_22] : memref<2x32xf32, #tpu.memory_space<vmem>>, vector<2x32xf32>
    tpu.vector_store %arg11[%c0_21, %c0_22], %20 {strides = array<i32>} : memref<2x32xf32, #tpu.memory_space<vmem>>, vector<2x32xf32>,
    %c0_23 = arith.constant 0 : index
    %c0_24 = arith.constant 0 : index
    %22 = vector.load %arg8[%c0_23, %c0_24] : memref<16x32xf32, #tpu.memory_space<vmem>>, vector<16x32xf32>
    %cst_25 = arith.constant dense<0.000000e+00> : vector<2x16xf32>
    %23 = tpu.matmul %20, %22, %cst_25 {dimension_numbers = #tpu.dot_dimension_numbers<[1], [1], [0], [0], [0, 0, 1, 0], [], []>} : vector<2x32xf32>, vector<16x32xf32>, vector<2x16xf32> -> vector<2x16xf32>
    %24 = arith.mulf %22, %22 : vector<16x32xf32>
    %cst_26 = arith.constant dense<0.000000e+00> : vector<16xf32>
    %25 = vector.multi_reduction <add>, %24, %cst_26 [1] : vector<16x32xf32> to vector<16xf32>
    %26 = vector.shape_cast %25 : vector<16xf32> to vector<1x16xf32>
    %cst_27 = arith.constant 2.000000e+00 : f32
    %27 = vector.broadcast %cst_27 : f32 to vector<2x16xf32>
    %28 = arith.mulf %27, %23 : vector<2x16xf32>
    %29 = vector.broadcast %26 : vector<1x16xf32> to vector<2x16xf32>
    %30 = arith.subf %29, %28 : vector<2x16xf32>
    %31 = tpu.reduce_index %30 {axis = 1 : i32, kind = #tpu.reduction_kind<arg_min>} : vector<2x16xf32> -> vector<2xi32>
    %32 = tpu.iota {dimensions = array<i32: 1>} : vector<2x16xi32>
    %33 = vector.shape_cast %31 : vector<2xi32> to vector<2x1xi32>
    %34 = vector.broadcast %33 : vector<2x1xi32> to vector<2x16xi32>
    %35 = arith.cmpi eq, %32, %34 : vector<2x16xi32>
    %36 = arith.extui %35 : vector<2x16xi1> to vector<2x16xi32>
    %37 = arith.sitofp %36 : vector<2x16xi32> to vector<2x16xf32>
    %cst_28 = arith.constant dense<0.000000e+00> : vector<2x32xf32>
    %38 = tpu.matmul %37, %22, %cst_28 {dimension_numbers = #tpu.dot_dimension_numbers<[1], [0], [0], [1], [0, 0, 1, 1], [], []>} : vector<2x16xf32>, vector<16x32xf32>, vector<2x32xf32> -> vector<2x32xf32>
    %c0_29 = arith.constant 0 : index
    %c0_30 = arith.constant 0 : index
    %39 = vector.load %arg12[%c0_29, %c0_30] : memref<2x32xf32, #tpu.memory_space<vmem>>, vector<2x32xf32>
    tpu.vector_store %arg12[%c0_29, %c0_30], %38 {strides = array<i32>} : memref<2x32xf32, #tpu.memory_space<vmem>>, vector<2x32xf32>,
    %40 = vector.shape_cast %31 : vector<2xi32> to vector<2x1xi32>
    %c0_31 = arith.constant 0 : index
    %c0_32 = arith.constant 0 : index
    %41 = vector.load %arg13[%c0_31, %c0_32] : memref<2x1xi32, #tpu.memory_space<vmem>>, vector<2x1xi32>
    tpu.vector_store %arg13[%c0_31, %c0_32], %40 {strides = array<i32>} : memref<2x1xi32, #tpu.memory_space<vmem>>, vector<2x1xi32>,
    %42 = arith.truncf %20 : vector<2x32xf32> to vector<2x32xbf16>
    %43 = arith.truncf %10 : vector<16x32xf32> to vector<16x32xbf16>
    %cst_33 = arith.constant dense<0.000000e+00> : vector<2x16xf32>
    %44 = tpu.matmul %42, %43, %cst_33 {dimension_numbers = #tpu.dot_dimension_numbers<[1], [1], [0], [0], [0, 0, 1, 0], [], []>} : vector<2x32xbf16>, vector<16x32xbf16>, vector<2x16xf32> -> vector<2x16xf32>
    %c0_34 = arith.constant 0 : index
    %c0_35 = arith.constant 0 : index
    %45 = vector.load %arg14[%c0_34, %c0_35] : memref<2x16xf32, #tpu.memory_space<vmem>>, vector<2x16xf32>
    tpu.vector_store %arg14[%c0_34, %c0_35], %44 {strides = array<i32>} : memref<2x16xf32, #tpu.memory_space<vmem>>, vector<2x16xf32>,
    %46 = arith.truncf %38 : vector<2x32xf32> to vector<2x32xbf16>
    %c0_36 = arith.constant 0 : index
    %c0_37 = arith.constant 0 : index
    %47 = vector.load %arg9[%c0_36, %c0_37] : memref<64x32xbf16, #tpu.memory_space<vmem>>, vector<64x32xbf16>
    %cst_38 = arith.constant dense<0.000000e+00> : vector<2x64xf32>
    %48 = tpu.matmul %46, %47, %cst_38 {dimension_numbers = #tpu.dot_dimension_numbers<[1], [1], [0], [0], [0, 0, 1, 0], [], []>} : vector<2x32xbf16>, vector<64x32xbf16>, vector<2x64xf32> -> vector<2x64xf32>
    %c0_39 = arith.constant 0 : index
    %c0_40 = arith.constant 0 : index
    %49 = vector.load %arg15[%c0_39, %c0_40] : memref<2x64xf32, #tpu.memory_space<vmem>>, vector<2x64xf32>
    tpu.vector_store %arg15[%c0_39, %c0_40], %48 {strides = array<i32>} : memref<2x64xf32, #tpu.memory_space<vmem>>, vector<2x64xf32>,
    return
  }
}

</mosaic_0001>

<bundles_post_ra>
// kernel: new_model_forward.1
= control target key start
LH: loop header
LB: loop body
LE: loop exit
PB: predicated region body
PF: predicated region fallthrough
CT: control target
= control target key end

     0   :  { %21 = vsyncpa [#allocation3], 0  ;;  %s887_s0 = inlined_call_operand.vmem [shape: bf16[16,16], index: 0, kind: input, shape index: {}]   ;;  %s888_s1 = inlined_call_operand.vmem [shape: bf16[16,32], index: 1, kind: input, shape index: {}]   ;;  %s889_s2 = inlined_call_operand.vmem [shape: bf16[32,32], index: 2, kind: input, shape index: {}]   ;;  %s890_s3 = inlined_call_operand.vmem [shape: f32[1,32], index: 3, kind: input, shape index: {}]   ;;  %s891_s4 = inlined_call_operand.vmem [shape: bf16[16,32], index: 4, kind: input, shape index: {}]   ;;  %s892_s5 = inlined_call_operand.vmem [shape: f32[2,16], index: 5, kind: input, shape index: {}]   ;;  %s893_s6 = inlined_call_operand.vmem [shape: bf16[32,32], index: 6, kind: input, shape index: {}]   ;;  %s894_s7 = inlined_call_operand.vmem [shape: f32[1,32], index: 7, kind: input, shape index: {}]   ;;  %s895_s8 = inlined_call_operand.vmem [shape: f32[16,32], index: 8, kind: input, shape index: {}]   ;;  %s896_s9 = inlined_call_operand.vmem [shape: bf16[64,32], index: 9, kind: input, shape index: {}]   ;;  %s897_s10 = inlined_call_operand.hbm [shape: f32[16,32], index: 10, kind: output, shape index: {0}]   ;;  %s898_s11 = inlined_call_operand.hbm [shape: f32[2,32], index: 11, kind: output, shape index: {1}]   ;;  %s899_s12 = inlined_call_operand.hbm [shape: f32[2,32], index: 12, kind: output, shape index: {2}]   ;;  %s900_s13 = inlined_call_operand.vmem [shape: s32[2,1], index: 13, kind: output, shape index: {3}]   ;;  %s901_s14 = inlined_call_operand.hbm [shape: f32[2,16], index: 14, kind: output, shape index: {4}]   ;;  %s902_s15 = inlined_call_operand.hbm [shape: f32[2,64], index: 15, kind: output, shape index: {5}]  }
   0x1   :  { %22 = vsyncpa [#allocation5], 0  ;;  %v551_v0 = vld [vmem:[%s888_s1] sm:$0xff] }
   0x2   :  { %v550_v1 = vld [vmem:[%s887_s0] sm:$0xff] }
   0x3   :  { %23 = vsyncpa [#allocation8], 0  ;;  %71 = vmatpush.bf16.msra.mxu0 %v551_v0  ;;  %vm60_vm0 = vcmask 130048   ;;  %v553_v2 = vld [vmem:[%s889_s2 + $0x8] sm:$0xff]  ;;  %v552_v3 = vld [vmem:[%s889_s2] sm:$0xff]  ;;  %vm99_vm1 = vcmask 261120   ;;  %v235_v30 = vlaneseq }
   0x4   :  { %109 = vmatpush.bf16.msra.mxu2 %v553_v2  ;;  %v556_v4 = vld [vmem:[%s893_s6 + $0x8] sm:$0xff]  ;;  %v555_v5 = vld [vmem:[%s893_s6] sm:$0xff]  ;;  %vm191_vm2 = vcmask 254976   ;;  %vm297_vm3 = vcmask 123904   ;;  %v709_v44 = vmov 0   ;;  %vm289_vm4 = vcmask 130112  }
   0x5   :  { %v554_v9 = vld [vmem:[%s891_s4] sm:$0xff]  ;;  %v194_v14 = vld [vmem:[%s895_s8 + $0x8] sm:$0xff]  ;;  %v236_v32 = vshrl.u32 %v235_v30, 7  ;;  %574 = vset.pattern.permute.xlu0 %v709_v44  ;;  %v285_v56 = vand.u32 127, %v235_v30  ;;  %vm294_vm5 = vcmask 1041409   ;;  %vm328_vm6 = vcmask 1024  }
   0x6   :  { %503 = vmatmul.msk.bf16.vlgmr.msra.gmra.mxu0 %vm60_vm0, %v550_v1  ;;  %v577_v10 = vld [vmem:[%s890_s3] ss:$0 sm:$0xff]  ;;  %v225_v33 = vmul.f32 %v194_v14, %v194_v14  ;;  %s431_s27 = sshll.u32 %s898_s11, 4  ;;  %s711_s28 = smov [#allocation4]   ;;  %vm409_vm8 = vcmask 517120   ;;  %s432_s27 = int_to_ptr.hbm [resolvable:$true] %s431_s27 }
   0x7   :  { %321 = vmatpush.msrb.mxu0 %v194_v14  ;;  %v193_v15 = vld [vmem:[%s895_s8] sm:$0xff]  ;;  %572 = vset.pattern.permute.xlu2 %v236_v32  ;;  %v243_v42 = vadd.s32 8, %v236_v32  ;;  %v287_v57 = vadd.s32 4294967288, %v285_v56  ;;  %s429_s29 = sshll.u32 %s711_s28, 4  ;;  %s455_s16 = sshll.u32 %s901_s14, 4  ;;  %s430_s29 = int_to_ptr.vmem [resolvable:$true] %s429_s29  ;;  %s456_s16 = int_to_ptr.hbm [resolvable:$true] %s455_s16 }
   0x8   :  { %110 = vmatpush.bf16.msra.mxu2 %v552_v3  ;;  %v578_v20 = vld [vmem:[%s894_s7] ss:$0 sm:$0xff]  ;;  %v224_v29 = vmul.f32 %v193_v15, %v193_v15  ;;  %570 = vset.pattern.permute.xlu1 %v236_v32  ;;  %v229_v34 = vsel %vm99_vm1, %v225_v33, 0.0  ;;  %s417_s11 = sshll.u32 %s897_s10, 4  ;;  %s713_s3 = smov [#allocation2]   ;;  %s418_s11 = int_to_ptr.hbm [resolvable:$true] %s417_s11 }
   0x9   :  { %322 = vmatpush.msrb.mxu0 %v193_v15  ;;  %v167_v25 = vld [vmem:[%s892_s5] sm:$0x3]  ;;  %s415_s4 = sshll.u32 %s713_s3, 4  ;;  %s714_s19 = smov 128   ;;  %s416_s4 = int_to_ptr.vmem [resolvable:$true] %s415_s4 }
   0xa   :  { %v226_v31 = vsel %vm99_vm1, %v224_v29, 0.0  ;;  %s715_s8 = smov 8   ;;  %s716_s5 = smov [#allocation6]  }
   0xb   :  { %227 = vadd.xlane.f32.xlu0 %v226_v31  ;;  %s440_s7 = sshll.u32 %s716_s5, 4  ;;  %s442_s14 = sshll.u32 %s899_s12, 4  ;;  %s441_s7 = int_to_ptr.vmem [resolvable:$true] %s440_s7  ;;  %s443_s14 = int_to_ptr.hbm [resolvable:$true] %s442_s14 }
   0xc   :  { %157 = vmatpush.bf16.msrb.mxu2 %v556_v4  ;;  %s717_s22 = smov [#allocation9]   ;;  %s466_s25 = sshll.u32 %s902_s15, 4  ;;  %s467_s25 = int_to_ptr.hbm [resolvable:$true] %s466_s25 }
   0xd   :  { %s464_s23 = sshll.u32 %s717_s22, 4  ;;  %s465_s23 = int_to_ptr.vmem [resolvable:$true] %s464_s23 }
  0x10   :  { %158 = vmatpush.bf16.msrb.mxu2 %v555_v5  ;;  %v560_v5 = vld [vmem:[%s896_s9 + $0x18] sm:$0xff] }
  0x13   :  { %230 = vadd.xlane.f32.xlu0 %v229_v34 }
  0x7e   :  { %v228_v45 = vpop.xlane.xlu0 %227 }
  0x83   :  { %v73_v6 = vpop.f32.mrf.mxu0 }
  0x86   :  { %v231_v50 = vpop.xlane.xlu0 %230 }
  0x8b   :  { %v75_v7 = vpop.f32.mrf.mxu0 }
  0x8c   :  { %v78_v8 = vpack.c.bf16 %v75_v7, %v73_v6  ;;  %v394_v6 = vsel %vm99_vm1, %v560_v5, 0  ;;  %v559_v7 = vld [vmem:[%s896_s9 + $0x10] sm:$0xff] }
  0x8d   :  { %400 = vmatpush.bf16.xpose.msra.mxu1 %v394_v6 }
  0x8e   :  { %512 = vmatmul.msk.bf16.vlgmr.msra.gmra.mxu2 %vm99_vm1, %v78_v8  ;;  %v391_v8 = vsel %vm99_vm1, %v559_v7, 0 }
  0x95   :  { %401 = vmatpush.bf16.xpose.msra.mxu1 %v391_v8 }
  0x9e   :  { %525 = vmatmul.msk.bf16.vlgmr.msrb.gmra.mxu2 %vm99_vm1, %v554_v9  ;;  %v558_v9 = vld [vmem:[%s896_s9 + $0x8] sm:$0xff] }
 0x111   :  { %v112_v11 = vpop.f32.mrf.mxu2 }
 0x112   :  { %v113_v12 = vadd.f32 %v577_v10, %v112_v11  ;;  %v557_v11 = vld [vmem:[%s896_s9] sm:$0xff] }
 0x114   :  { %v117_v13 = vmax.f32 %v113_v12, 0.0  ;;  %v385_v12 = vsel %vm99_vm1, %v557_v11, 0 }
 0x116   :  { %119 = vst.msk [vmem:[#allocation2] sm:$0xff] %vm99_vm1, %v117_v13 }
 0x119   :  { %v114_v16 = vpop.f32.mrf.mxu2 }
 0x11a   :  { %v115_v17 = vadd.f32 %v577_v10, %v114_v16  ;;  %v388_v10 = vsel %vm99_vm1, %v558_v9, 0 }
 0x11b   :  { %402 = vmatpush.bf16.xpose.msra.mxu1 %v388_v10 }
 0x11c   :  { %v118_v18 = vmax.f32 %v115_v17, 0.0 }
 0x11e   :  { %120 = vst.msk [vmem:[#allocation2 + $0x8] sm:$0xff] %vm99_vm1, %v118_v18  ;;  %v331_v27 = vpack.c.bf16 %v118_v18, %v117_v13 }
 0x11f   :  { %423 = dma.vmem_to_hbm [thread:$0]  %s416_s4, 256, %s418_s11, [#allocation3], %s714_s19, %s714_s19, %s715_s8  }
 0x120   :  { %v336_v28 = vsel %vm99_vm1, %v331_v27, 0 }
 0x121   :  { %v160_v19 = vpop.f32.mrf.mxu2 }
 0x122   :  { %v161_v22 = vadd.f32 %v578_v20, %v160_v19 }
 0x123   :  { %403 = vmatpush.bf16.xpose.msra.mxu1 %v385_v12 }
 0x129   :  { %v162_v21 = vpop.f32.mrf.mxu2 }
 0x12a   :  { %v163_v23 = vadd.f32 %v578_v20, %v162_v21 }
 0x12c   :  { %579 = vtanh.f32 %v163_v23 }
 0x12d   :  { %581 = vtanh.f32 %v161_v22 }
 0x132   :  { %v580_v24 = vpop.eup %579 }
 0x133   :  { %185 = vmatpush.msra.mxu3 %v580_v24  ;;  %v582_v26 = vpop.eup %581 }
 0x135   :  { %186 = vmatpush.msra.mxu3 %v582_v26 }
 0x136   :  { %526 = vmatmul.msk.f32.vlgmr.msra.gmra.mxu3 %vm60_vm0, %v167_v25 }
 0x137   :  { %527 = vmatpush.xpose.msk.msrb.mxu3 %vm99_vm1, %v194_v14  ;;  %v710_v14 = vmov 0.0  }
 0x13b   :  { %528 = vmatpush.xpose.msk.msrb.mxu3 %vm99_vm1, %v193_v15 }
 0x13f   :  { %345 = vmatpush.bf16.xpose.msra.mxu3 %v336_v28 }
 0x1b9   :  { %v188_v35 = vpop.f32.mrf.mxu3 }
 0x1ba   :  { %529 = vmatmul.msk.f32.vlgmr.msrb.gmra.mxu3 %vm99_vm1, %v188_v35  ;;  %192 = vst.msk [vmem:[#allocation4] sm:$0x3] %vm191_vm2, %v188_v35  ;;  %v330_v36 = vpack.c.bf16 %v188_v35, %v188_v35 }
 0x1bb   :  { %434 = dma.vmem_to_hbm [thread:$0]  %s430_s29, 32, %s432_s27, [#allocation5]  }
 0x1c2   :  { %532 = vmatmul.msk.bf16.vlgmr.msra.gmra.mxu3 %vm99_vm1, %v330_v36 }
 0x23d   :  { %v221_v37 = vpop.f32.mrf.mxu3 }
 0x23e   :  { %v232_v38 = vmul.f32 2.0, %v221_v37 }
 0x240   :  { %v247_v39 = vperm.slane %v232_v38, 1  ;;  %v234_v40 = vperm.slane %v232_v38, 0 }
 0x242   :  { %252 = vperm.xlu2 %572, %v247_v39   ;;  %239 = vperm.xlu1 %570, %v234_v40  }
 0x245   :  { %v347_v41 = vpop.f32.mrf.mxu3 }
 0x246   :  { %351 = vst.msk [vmem:[#allocation7] sm:$0x3] %vm297_vm3, %v347_v41 }
 0x24a   :  { %573 = vset.pattern.permute.xlu2 %v243_v42  ;;  %571 = vset.pattern.permute.xlu1 %v243_v42 }
 0x24d   :  { %v349_v43 = vpop.f32.mrf.mxu3 }
 0x252   :  { %258 = vperm.xlu2 %573, %v247_v39   ;;  %245 = vperm.xlu1 %571, %v234_v40  }
 0x25a   :  { %576 = vset.pattern.permute.xlu2 %v709_v44  ;;  %575 = vset.pattern.permute.xlu1 %v709_v44 }
 0x29c   :  { %v253_v46 = vpop.permute.xlu2 %252 }
 0x29d   :  { %v266_v47 = vsub.f32 %v228_v45, %v253_v46 }
 0x29f   :  { %279 = vperm.xlu2 %576, %v266_v47  }
 0x2ac   :  { %v259_v53 = vpop.permute.xlu2 %258 }
 0x2ad   :  { %v267_v54 = vsub.f32 %v231_v50, %v259_v53 }
 0x2b4   :  { %v240_v48 = vpop.permute.xlu1 %239 }
 0x2b5   :  { %v264_v49 = vsub.f32 %v228_v45, %v240_v48 }
 0x2b7   :  { %273 = vperm.xlu0 %574, %v264_v49  }
 0x2c4   :  { %v246_v51 = vpop.permute.xlu1 %245 }
 0x2c5   :  { %v265_v52 = vsub.f32 %v231_v50, %v246_v51 }
 0x2c7   :  { %276 = vperm.xlu1 %575, %v265_v52  }
 0x2cf   :  { %282 = vperm.xlu1 %575, %v267_v54  }
 0x2f9   :  { %v280_v58 = vpop.permute.xlu2 %279 }
 0x2fa   :  { %v291_v62 = vperm.slane %v280_v58, %v285_v56 }
 0x329   :  { %v274_v59 = vpop.permute.xlu0 %273 }
 0x32a   :  { %v286_v63 = vperm.slane %v274_v59, %v285_v56 }
 0x339   :  { %v277_v55 = vpop.permute.xlu1 %276 }
 0x33a   :  { %v288_v60 = vperm.slane %v277_v55, %v287_v57 }
 0x33c   :  { %v290_v1 = vsel %vm289_vm4, %v288_v60, %v286_v63 }
 0x341   :  { %v283_v61 = vpop.permute.xlu1 %282 }
 0x342   :  { %v292_v0 = vperm.slane %v283_v61, %v287_v57 }
 0x344   :  { %v293_v2 = vsel %vm289_vm4, %v292_v0, %v291_v62 }
 0x345   :  { %v295_v3 = vsel %vm294_vm5, %v293_v2, %v290_v1 }
 0x346   :  { %v298_v4 = vsel %vm297_vm3, %v295_v3, inf }
 0x347   :  { %299 = vmin.index.xlane.f32.xlu2 %v298_v4 }
 0x3ba   :  { %v300_v13 = vpop.xlane.xlu2 %299 }
 0x3bb   :  { %vm301_vm7 = vcmp.eq.s32.totalorder %v285_v56, %v300_v13  ;;  %329 = vst.msk [vmem:[%s900_s13] sm:$0x3] %vm328_vm6, %v300_v13  ;;  %s712_s13 = smov [#allocation7]  }
 0x3bc   :  { %v530_v15 = vsel %vm301_vm7, 1.0, %v710_v14  ;;  %s453_s2 = sshll.u32 %s712_s13, 4  ;;  %s454_s2 = int_to_ptr.vmem [resolvable:$true] %s453_s2 }
 0x3bd   :  { %531 = vmatmul.msk.f32.vlgmr.msrb.gmra.mxu0 %vm60_vm0, %v530_v15  ;;  %458 = dma.vmem_to_hbm [thread:$0]  %s454_s2, 32, %s456_s16, [#allocation8]  }
 0x43a   :  { %v324_v16 = vpop.f32.mrf.mxu0 }
 0x43b   :  { %327 = vst.msk [vmem:[#allocation6] sm:$0x3] %vm191_vm2, %v324_v16  ;;  %v352_v17 = vpack.c.bf16 %v324_v16, %v324_v16 }
 0x43c   :  { %445 = dma.vmem_to_hbm [thread:$0]  %s441_s7, 32, %s443_s14, [#allocation5]  }
 0x43d   :  { %549 = vmatmul.msk.bf16.vlgmr.msra.gmra.mxu1 %vm99_vm1, %v352_v17 }
 0x4ba   :  { %v405_v18 = vpop.f32.mrf.mxu1 }
 0x4bb   :  { %410 = vst.msk [vmem:[#allocation9] sm:$0x3] %vm409_vm8, %v405_v18 }
 0x4bc   :  { %469 = dma.vmem_to_hbm [thread:$0]  %s465_s23, 32, %s467_s25, [#allocation8]  }
 0x4c2   :  { %v407_v19 = vpop.f32.mrf.mxu1 }
 0x4c3   :  { %703 = dma.done.wait [#allocation3], 256  }
 0x4c4   :  { %704 = vsyncadd [#allocation3], 4294967040 }
 0x4c5   :  { %705 = dma.done.wait [#allocation5], 64  }
 0x4c6   :  { %706 = vsyncadd [#allocation5], 4294967232 }
 0x4c7   :  { %707 = dma.done.wait [#allocation8], 64  }
 0x4c8   :  { %708 = vsyncadd [#allocation8], 4294967232 }
 0x4c9   :  { %492 = vsyncpa [#allocation3], 1 }
 0x4ca   :  { %493 = vsyncpa [#allocation5], 1 }
 0x4cb   :  { %494 = vsyncpa [#allocation8], 1 }

</bundles_post_ra>
